<compile_context>
chip_gen: v6e
topology: v6e:2x2x1
jax: 0.10.0
libtpu: 0.0.40
codegen_flags: <defaults>
</compile_context>

<pallas_src>
import math
import functools

import jax
import jax.numpy as jnp
from jax.experimental import pallas as pl
from jax.experimental.pallas import tpu as pltpu

_MIB = 1024 * 1024


def _attention_kernel(x_ref, v_ref, len_ref, rep_ref, att_ref):
    """One batch-tile of the attention pooling.

    x_ref   : (TB, T, H)  activations, native dtype (bf16 stays bf16 in VMEM)
    v_ref   : (1, H)      attention vector, f32
    len_ref : (TB, 1)     int32 valid lengths
    rep_ref : (TB, H)     output representations (dense 2-D store)
    att_ref : (TB, T)     output attention weights
    """
    x = x_ref[...]                                      # native dtype; never copied to f32
    v = v_ref[...]                                      # (1, H) f32
    lengths = len_ref[...]                              # (TB, 1) i32

    tb, t, h = x.shape

    # logits[b, t] = <x[b, t, :], v> with f32 accumulation; the cast is fused
    # into this single multiply pass (no standalone f32 tile kept live).
    logits = jnp.sum(x.astype(jnp.float32) * v, axis=-1)            # (TB, T)

    # Length mask. Mask logits before max/exp (overflow-safe if padding holds
    # garbage); keep the multiplicative mask after exp so zero-length rows
    # still produce 0/0 = NaN, matching the PyTorch module.
    idx = jax.lax.broadcasted_iota(jnp.int32, (tb, t), 1)
    valid = idx < lengths                                            # (TB, T) bool
    safe_logits = jnp.where(valid, logits, jnp.float32(-1e30))

    # Per-row max (PyTorch uses a global max; the shift cancels in the
    # normalization, so results are identical and batch rows stay independent).
    row_max = jnp.max(safe_logits, axis=-1, keepdims=True)           # (TB, 1)
    unnorm = jnp.exp(safe_logits - row_max)                          # (TB, T)
    masked = unnorm * valid.astype(jnp.float32)                      # (TB, T)

    att_sums = jnp.sum(masked, axis=-1, keepdims=True)               # (TB, 1)
    inv_sums = 1.0 / att_sums                                        # exact divide (tiny op)
    att_ref[...] = (masked * inv_sums).astype(att_ref.dtype)

    # Weighted sum over T on the MXU with native-dtype operands and f32
    # accumulation; normalization deferred to the small (TB, H) result.
    # (On v7x, if the M=1 per-row weight pushes fall outside the shorter DMA
    # shadow, a VPU multiply + sublane-reduce over T is the drop-in swap.)
    w3 = masked.astype(x.dtype)[:, None, :]                          # (TB, 1, T)
    rep3 = jnp.einsum("bqt,bth->bqh", w3, x,
                      preferred_element_type=jnp.float32)            # (TB, 1, H)
    rep = rep3.reshape(tb, h) * inv_sums                             # (TB, H)
    rep_ref[...] = rep.astype(rep_ref.dtype)


def _vmem_capacity_bytes():
    try:
        return int(pltpu.get_tpu_info().vmem_capacity_bytes)
    except Exception:
        return 128 * _MIB


def _choose_tile_b(B, T, H, in_itemsize, out_itemsize, target_tile_bytes):
    """Batch rows per grid step.

    Keeps the double-buffered input tile at a few MiB (near the HBM roofline),
    rounds to the output dtype's sublane tile so output stores stay dense, and
    prefers >= 2 grid steps when B is large enough so both v7x TensorCores get
    work under dimension_semantics=("parallel",).
    """
    sublane = 8 if out_itemsize >= 4 else 16
    row_bytes = max(T * H * in_itemsize, 1)
    rows = max(int(target_tile_bytes // row_bytes), 1)

    if rows >= B:
        if B >= 2 * sublane:
            half = -(-B // 2)  # ceil(B / 2): >=2 grid steps, still sublane-aligned
            return min(max((half // sublane) * sublane, sublane), B)
        return B
    return min(max((rows // sublane) * sublane, min(sublane, B)), B)


@functools.partial(jax.jit, static_argnames=("return_attention",))
def attention_forward(inputs, input_lengths, attention_vector,
                      return_attention=True):
    """Pallas equivalent of Attention.forward.

    inputs          : (B, T, H)
    input_lengths   : (B,)   integer
    attention_vector: (H,)   float
    """
    B, T, H = inputs.shape
    lengths_2d = input_lengths.astype(jnp.int32).reshape(B, 1)
    v_2d = attention_vector.astype(jnp.float32).reshape(1, H)

    out_dtype = inputs.dtype
    in_itemsize = jnp.dtype(inputs.dtype).itemsize
    out_itemsize = jnp.dtype(out_dtype).itemsize

    # Chip-aware budgets: v7x has 64 MiB VMEM/TC -> ~48 MiB scoped limit and
    # ~4 MiB tiles; v5e/v6e have 128 MiB -> 96 MiB limit and ~8 MiB tiles.
    vmem_cap = _vmem_capacity_bytes()
    if vmem_cap >= 96 * _MIB:
        vmem_limit = 96 * _MIB
        target_tile_bytes = 8 * _MIB
    else:
        vmem_limit = min(48 * _MIB, int(vmem_cap * 3 // 4))
        target_tile_bytes = 4 * _MIB

    tile_b = _choose_tile_b(B, T, H, in_itemsize, out_itemsize,
                            target_tile_bytes)
    grid = (pl.cdiv(B, tile_b),)

    cost = pl.CostEstimate(
        flops=int(4 * B * T * H),                      # logits dot + weighted sum
        transcendentals=int(B * T),                    # exp
        bytes_accessed=int(B * T * H * in_itemsize     # inputs
                           + B * H * out_itemsize      # representations
                           + B * T * out_itemsize      # attentions
                           + B * 4 + H * 4),           # lengths + attention vec
    )

    reps, attns = pl.pallas_call(
        _attention_kernel,
        grid=grid,
        in_specs=[
            pl.BlockSpec((tile_b, T, H), lambda i: (i, 0, 0)),   # inputs tile
            pl.BlockSpec((1, H), lambda i: (0, 0)),              # attention vec
            pl.BlockSpec((tile_b, 1), lambda i: (i, 0)),         # lengths tile
        ],
        out_specs=(
            pl.BlockSpec((tile_b, H), lambda i: (i, 0)),         # representations
            pl.BlockSpec((tile_b, T), lambda i: (i, 0)),         # attentions
        ),
        out_shape=(
            jax.ShapeDtypeStruct((B, H), out_dtype),
            jax.ShapeDtypeStruct((B, T), out_dtype),
        ),
        compiler_params=pltpu.CompilerParams(
            dimension_semantics=("parallel",),
            vmem_limit_bytes=vmem_limit,
        ),
        cost_estimate=cost,
    )(inputs, v_2d, lengths_2d)

    return reps, (attns if return_attention else None)


def _reference_forward(inputs, input_lengths, attention_vector):
    """Pure-JAX reference matching the PyTorch semantics (global max)."""
    logits = inputs @ attention_vector                    # (B, T)
    unnorm = jnp.exp(logits - logits.max())
    B, T = unnorm.shape
    idx = jnp.arange(T)[None, :]
    mask = (idx < input_lengths[:, None]).astype(jnp.float32)
    masked = unnorm * mask
    sums = masked.sum(axis=1, keepdims=True)
    attn = masked / sums
    reps = (inputs * attn[:, :, None]).sum(axis=1)
    return reps, attn


if __name__ == "__main__":
    B, T, H = 2, 8, 32          # batch, seq length, attention_size
    # Note: for production shapes, keep T and H multiples of 128 so the
    # output stores are lane-dense; these toy shapes are deliberately small.

    key = jax.random.PRNGKey(0)
    k_x, k_v = jax.random.split(key)

    # Deterministic parameter init mirroring reset_parameters():
    # uniform(-stdv, stdv) with stdv = 1/sqrt(attention_size).
    stdv = 1.0 / math.sqrt(H)
    attention_vector = jax.random.uniform(
        k_v, (H,), minval=-stdv, maxval=stdv, dtype=jnp.float32)

    inputs = jax.random.normal(k_x, (B, T, H), dtype=jnp.float32)
    input_lengths = jnp.array([8, 5], dtype=jnp.int32)

    reps, attns = attention_forward(inputs, input_lengths, attention_vector,
                                    return_attention=True)
    reps = jax.block_until_ready(reps)
    attns = jax.block_until_ready(attns)

    # Cross-check against the pure-JAX reference of the PyTorch forward.
    ref_reps, ref_attns = _reference_forward(inputs, input_lengths,
                                             attention_vector)
    assert reps.shape == (B, H) and attns.shape == (B, T)
    # Attention path is pure f32 VPU math with exact division -> tight check.
    assert jnp.allclose(attns, ref_attns, atol=1e-5, rtol=1e-5)
    assert jnp.allclose(attns.sum(axis=1), 1.0, atol=1e-5)
    # Representations go through the MXU (f32 accumulation; accumulation order
    # differs from the reference reduce) -> slightly looser check.
    assert jnp.allclose(reps, ref_reps, atol=1e-4, rtol=1e-3)

    print("KERNEL_OK")
</pallas_src>

<mosaic_0001>
module attributes {stable_mosaic.version = 11 : i64} {
  func.func @_attention_kernel(%arg0: i32, %arg1: memref<2x8x32xf32, #tpu.memory_space<vmem>>, %arg2: memref<1x32xf32, #tpu.memory_space<vmem>>, %arg3: memref<2x1xi32, #tpu.memory_space<vmem>>, %arg4: memref<2x32xf32, #tpu.memory_space<vmem>>, %arg5: memref<2x8xf32, #tpu.memory_space<vmem>>) attributes {dimension_semantics = [#tpu.dimension_semantics<parallel>], iteration_bounds = array<i64: 1>, scalar_prefetch = 0 : i64, scratch_operands = 0 : i64, tpu.core_type = #tpu.core_type<tc>, window_params = [{transform_indices = @transform_0, window_bounds = array<i64: 2, 8, 32>}, {pipeline_mode = #tpu.pipeline_mode<synchronous>, transform_indices = @transform_1, window_bounds = array<i64: 1, 32>}, {transform_indices = @transform_2, window_bounds = array<i64: 2, 1>}, {transform_indices = @transform_3, window_bounds = array<i64: 2, 32>}, {transform_indices = @transform_4, window_bounds = array<i64: 2, 8>}]} {
    %c0 = arith.constant 0 : index
    %c0_0 = arith.constant 0 : index
    %c0_1 = arith.constant 0 : index
    %0 = vector.load %arg1[%c0, %c0_0, %c0_1] : memref<2x8x32xf32, #tpu.memory_space<vmem>>, vector<2x8x32xf32>
    %c0_2 = arith.constant 0 : index
    %c0_3 = arith.constant 0 : index
    %1 = vector.load %arg2[%c0_2, %c0_3] : memref<1x32xf32, #tpu.memory_space<vmem>>, vector<1x32xf32>
    %c0_4 = arith.constant 0 : index
    %c0_5 = arith.constant 0 : index
    %2 = vector.load %arg3[%c0_4, %c0_5] : memref<2x1xi32, #tpu.memory_space<vmem>>, vector<2x1xi32>
    %3 = vector.shape_cast %1 : vector<1x32xf32> to vector<1x1x32xf32>
    %4 = vector.broadcast %3 : vector<1x1x32xf32> to vector<2x8x32xf32>
    %5 = arith.mulf %0, %4 : vector<2x8x32xf32>
    %cst = arith.constant dense<0.000000e+00> : vector<2x8xf32>
    %6 = vector.multi_reduction <add>, %5, %cst [2] : vector<2x8x32xf32> to vector<2x8xf32>
    %7 = tpu.iota {dimensions = array<i32: 1>} : vector<2x8xi32>
    %8 = vector.broadcast %2 : vector<2x1xi32> to vector<2x8xi32>
    %9 = arith.cmpi slt, %7, %8 : vector<2x8xi32>
    %cst_6 = arith.constant -1.000000e+30 : f32
    %10 = vector.broadcast %cst_6 : f32 to vector<2x8xf32>
    %11 = arith.select %9, %6, %10 : vector<2x8xi1>, vector<2x8xf32>
    %cst_7 = arith.constant dense<0xFF800000> : vector<2xf32>
    %12 = vector.multi_reduction <maximumf>, %11, %cst_7 [1] : vector<2x8xf32> to vector<2xf32>
    %13 = vector.shape_cast %12 : vector<2xf32> to vector<2x1xf32>
    %14 = vector.broadcast %13 : vector<2x1xf32> to vector<2x8xf32>
    %15 = arith.subf %11, %14 : vector<2x8xf32>
    %16 = math.exp %15 : vector<2x8xf32>
    %17 = arith.extui %9 : vector<2x8xi1> to vector<2x8xi32>
    %18 = arith.sitofp %17 : vector<2x8xi32> to vector<2x8xf32>
    %19 = arith.mulf %16, %18 : vector<2x8xf32>
    %cst_8 = arith.constant dense<0.000000e+00> : vector<2xf32>
    %20 = vector.multi_reduction <add>, %19, %cst_8 [1] : vector<2x8xf32> to vector<2xf32>
    %21 = vector.shape_cast %20 : vector<2xf32> to vector<2x1xf32>
    %cst_9 = arith.constant 1.000000e+00 : f32
    %22 = vector.broadcast %cst_9 : f32 to vector<2x1xf32>
    %23 = arith.divf %22, %21 : vector<2x1xf32>
    %24 = vector.broadcast %23 : vector<2x1xf32> to vector<2x8xf32>
    %25 = arith.mulf %19, %24 : vector<2x8xf32>
    %c0_10 = arith.constant 0 : index
    %c0_11 = arith.constant 0 : index
    %26 = vector.load %arg5[%c0_10, %c0_11] : memref<2x8xf32, #tpu.memory_space<vmem>>, vector<2x8xf32>
    tpu.vector_store %arg5[%c0_10, %c0_11], %25 {strides = array<i32>} : memref<2x8xf32, #tpu.memory_space<vmem>>, vector<2x8xf32>,
    %27 = vector.shape_cast %19 : vector<2x8xf32> to vector<2x1x8xf32>
    "tpu.trace_start"() <{level = 10 : i32, message = "bqt,bth->bqh"}> : () -> ()
    %cst_12 = arith.constant dense<0.000000e+00> : vector<2x1x32xf32>
    %28 = tpu.matmul %27, %0, %cst_12 {dimension_numbers = #tpu.dot_dimension_numbers<[2], [1], [1], [2], [0, 0, 0, 1, 1, 2], [0], [0]>} : vector<2x1x8xf32>, vector<2x8x32xf32>, vector<2x1x32xf32> -> vector<2x1x32xf32>
    "tpu.trace_stop"() : () -> ()
    %29 = vector.shape_cast %28 : vector<2x1x32xf32> to vector<2x32xf32>
    %30 = vector.broadcast %23 : vector<2x1xf32> to vector<2x32xf32>
    %31 = arith.mulf %29, %30 : vector<2x32xf32>
    %c0_13 = arith.constant 0 : index
    %c0_14 = arith.constant 0 : index
    %32 = vector.load %arg4[%c0_13, %c0_14] : memref<2x32xf32, #tpu.memory_space<vmem>>, vector<2x32xf32>
    tpu.vector_store %arg4[%c0_13, %c0_14], %31 {strides = array<i32>} : memref<2x32xf32, #tpu.memory_space<vmem>>, vector<2x32xf32>,
    return
  }
  func.func @transform_0(%arg0: i32) -> (i32, i32, i32) {
    %c0_i32 = arith.constant 0 : i32
    %c0_i32_0 = arith.constant 0 : i32
    %c0_i32_1 = arith.constant 0 : i32
    return %arg0, %c0_i32, %c0_i32_0 : i32, i32, i32
  }
  func.func @transform_1(%arg0: i32) -> (i32, i32) {
    %c0_i32 = arith.constant 0 : i32
    %c0_i32_0 = arith.constant 0 : i32
    %c0_i32_1 = arith.constant 0 : i32
    return %c0_i32, %c0_i32_0 : i32, i32
  }
  func.func @transform_2(%arg0: i32) -> (i32, i32) {
    %c0_i32 = arith.constant 0 : i32
    %c0_i32_0 = arith.constant 0 : i32
    return %arg0, %c0_i32 : i32, i32
  }
  func.func @transform_3(%arg0: i32) -> (i32, i32) {
    %c0_i32 = arith.constant 0 : i32
    %c0_i32_0 = arith.constant 0 : i32
    return %arg0, %c0_i32 : i32, i32
  }
  func.func @transform_4(%arg0: i32) -> (i32, i32) {
    %c0_i32 = arith.constant 0 : i32
    %c0_i32_0 = arith.constant 0 : i32
    return %arg0, %c0_i32 : i32, i32
  }
}

</mosaic_0001>

<bundles_post_ra>
// kernel: attention_forward.1
= control target key start
LH: loop header
LB: loop body
LE: loop exit
PB: predicated region body
PF: predicated region fallthrough
CT: control target
= control target key end

     0   :  { %10 = vsyncpa [#allocation3], 0  ;;  %s453_s0 = inlined_call_operand.hbm [shape: f32[2,8,32], index: 0, kind: input, shape index: {}]   ;;  %s454_s1 = inlined_call_operand.vmem [shape: f32[1,32], index: 1, kind: input, shape index: {}]   ;;  %s455_s2 = inlined_call_operand.vmem [shape: s32[2,1], index: 2, kind: input, shape index: {}]   ;;  %s456_s3 = inlined_call_operand.hbm [shape: f32[2,32], index: 3, kind: output, shape index: {0}]   ;;  %s457_s4 = inlined_call_operand.hbm [shape: f32[2,8], index: 4, kind: output, shape index: {1}]  }
   0x1   :  { %11 = vsyncpa [#allocation4], 0 }
   0x2   :  { %12 = vsyncpa [#allocation7], 0  ;;  %s397_s15 = smov [#allocation2]  }
   0x3   :  { %s18_s16 = sshll.u32 %s397_s15, 4  ;;  %s19_s16 = int_to_ptr.vmem [resolvable:$true] %s18_s16 }
   0x4   :  { %s339_s17 = scalar_lea.vmem %s19_s16, 256  ;;  %p344_p1 = scmp.lt.s32.totalorder %s19_s16, %s19_s16 }
   0x5   :  { %p340_p0 = scmp.ne.s32.totalorder %s19_s16, %s339_s17  ;;  %p345_p2 = scmp.lt.s32.totalorder %s339_s17, %s339_s17 }
   0x7   :  { %p346_p3 = por %p345_p2, %p344_p1 }
   0x9   :  { %p347_p4 = pnand %p346_p3, %p340_p0 }
   0xb   :  { %350 = shalt.err (!%p347_p4)
}
   0xc   :  { %s398_s18 = smov 128   ;;  %s399_s19 = smov 8  }
   0xd   :  { %24 = dma.hbm_to_vmem [thread:$0]  %s453_s0, 256, %s19_s16, [#allocation3], %s398_s18, %s398_s18, %s399_s19  }
   0xe   :  { %391 = dma.done.wait [#allocation3], 256  }
   0xf   :  { %392 = vsyncadd [#allocation3], 4294967040  ;;  %v400_v0 = vmov 0   ;;  %v32_v1 = vld [vmem:[#allocation2] sm:$0xff]  ;;  %vm44_vm0 = vcmask 261120   ;;  %v33_v3 = vld [vmem:[#allocation2 + $0x8] sm:$0xff]  ;;  %v51_v10 = vlaneseq }
  0x10   :  { %325 = vset.pattern.permute.xlu1 %v400_v0  ;;  %326 = vset.pattern.permute.xlu0 %v400_v0  ;;  %v298_v2 = vld [vmem:[%s454_s1] ss:$0 sm:$0xff]  ;;  %v401_v9 = vmov 0.0   ;;  %vm67_vm1 = vcmask 1041409   ;;  %vm71_vm3 = vcmask 58368   ;;  %vm402_vm4 = vmmov 0  }
  0x11   :  { %v42_v4 = vmul.f32 %v298_v2, %v32_v1  ;;  %v43_v5 = vmul.f32 %v298_v2, %v33_v3  ;;  %v35_v6 = vld [vmem:[%s455_s2] sm:$0x3]  ;;  %306 = vmatprep.subr.mxu0 %v401_v9  ;;  %311 = vmatprep.subr.mxu1 %v401_v9  ;;  %v52_v11 = vand.u32 127, %v51_v10  ;;  %v60_v12 = vshrl.u32 %v51_v10, 7  ;;  %s404_s0 = smov [#allocation6]  }
  0x12   :  { %54 = vperm.xlu1 %325, %v35_v6   ;;  %307 = vmatpush3.msra.mxu0 %v32_v1  ;;  %v403_v25 = vmov 1966171168   ;;  %vm111_vm5 = vcmask 64512   ;;  %s285_s1 = sshll.u32 %s404_s0, 4  ;;  %s286_s1 = int_to_ptr.vmem [resolvable:$true] %s285_s1 }
  0x13   :  { %v45_v7 = vsel %vm44_vm0, %v42_v4, 0.0  ;;  %v48_v8 = vsel %vm44_vm0, %v43_v5, 0.0  ;;  %312 = vmatpush3.msra.mxu1 %v33_v3  ;;  %v61_v14 = vsub.s32 %v52_v11, %v60_v12  ;;  %308 = vmatprep.mubr.msk.f32.mxu0 %vm402_vm4, %v401_v9  ;;  %v90_v26 = vunpack.c.l.s4 %v403_v25  ;;  %s351_s2 = scalar_lea.vmem %s286_s1, 32  ;;  %p356_p6 = scmp.lt.s32.totalorder %s286_s1, %s286_s1 }
  0x14   :  { %46 = vadd.xlane.f32.xlu0 %v45_v7  ;;  %313 = vmatprep.mubr.msk.f32.mxu1 %vm402_vm4, %v401_v9  ;;  %p352_p5 = scmp.ne.s32.totalorder %s286_s1, %s351_s2  ;;  %p357_p7 = scmp.lt.s32.totalorder %s351_s2, %s351_s2 }
  0x15   :  { %v91_v27 = vunpack.c.0.s8 %v90_v26 }
  0x16   :  { %p358_p8 = por %p357_p7, %p356_p6 }
  0x17   :  { %v94_v28 = vsub.s32 %v91_v27, %v60_v12 }
  0x18   :  { %49 = vadd.xlane.f32.xlu0 %v48_v8  ;;  %p359_p9 = pnand %p358_p8, %p352_p5 }
  0x8d   :  { %v55_v15 = vpop.permute.xlu1 %54 }
  0x8e   :  { %vm56_vm2 = vcmp.lt.s32.totalorder %v52_v11, %v55_v15 }
  0x8f   :  { %v299_v30 = vsel %vm56_vm2, 1.0, %v401_v9 }
  0x9d   :  { %v47_v13 = vpop.xlane.xlu0 %46 }
  0x9e   :  { %v62_v17 = vrot.slane %v47_v13, %v61_v14 }
  0xa1   :  { %v50_v16 = vpop.xlane.xlu0 %49 }
  0xa2   :  { %v66_v18 = vrot.slane %v50_v16, %v61_v14 }
  0xa4   :  { %v68_v19 = vsel %vm67_vm1, %v66_v18, %v62_v17 }
  0xa5   :  { %v70_v20 = vsel %vm56_vm2, %v68_v19, -1e+30 }
  0xa6   :  { %v72_v21 = vsel %vm71_vm3, %v70_v20, -inf }
  0xa7   :  { %73 = vmax.xlane.f32.xlu1 %v72_v21 }
 0x130   :  { %v74_v22 = vpop.xlane.xlu1 %73 }
 0x131   :  { %v75_v23 = vsub.f32 %v70_v20, %v74_v22 }
 0x133   :  { %v76_v24 = vmul.f32 1.442695, %v75_v23 }
 0x135   :  { %327 = vpow2.f32 %v76_v24 }
 0x142   :  { %v328_v29 = vpop.eup %327 }
 0x143   :  { %v80_v31 = vmul.f32 %v328_v29, %v299_v30 }
 0x145   :  { %v81_v32 = vsel %vm71_vm3, %v80_v31, 0.0  ;;  %v95_v33 = vrot.slane %v80_v31, %v94_v28 }
 0x146   :  { %82 = vadd.xlane.f32.xlu0 %v81_v32 }
 0x147   :  { %v103_v34 = vrot.slane %v95_v33, %v94_v28  ;;  %v96_v35 = vcombine.high %v95_v33, %v95_v33 }
 0x149   :  { %309 = vmatmul.mubr.msk.f32.vlgmr.msra.gmra.mxu0 %vm111_vm5, %v103_v34  ;;  %v110_v36 = vrot.slane %v96_v35, %v94_v28 }
 0x14b   :  { %314 = vmatmul.mubr.msk.f32.vlgmr.msra.gmra.mxu1 %vm111_vm5, %v110_v36 }
 0x1cf   :  { %v83_v37 = vpop.xlane.xlu0 %82 }
 0x1d0   :  { %329 = vrcp.f32 %v83_v37 }
 0x1dd   :  { %v330_v38 = vpop.eup %329 }
 0x1de   :  { %v86_v39 = vmul.f32 %v330_v38, %v80_v31 }
 0x1e0   :  { %87 = vst.msk [vmem:[#allocation6] sm:$0x3] %vm71_vm3, %v86_v39 }
 0x1e1   :  { %362 = shalt.err (!%p359_p9)
}
 0x1e2   :  { %288 = dma.vmem_to_hbm [thread:$0]  %s286_s1, 32, %s457_s4, [#allocation7]   ;;  %v257_v41 = vrot.slane %v330_v38, 1  ;;  %vm267_vm6 = vcmask 254976  }
 0x1e3   :  { %s405_s28 = smov [#allocation5]  }
 0x1e4   :  { %s275_s29 = sshll.u32 %s405_s28, 4  ;;  %s276_s29 = int_to_ptr.vmem [resolvable:$true] %s275_s29 }
 0x1e5   :  { %s371_s30 = scalar_lea.vmem %s276_s29, 32  ;;  %p376_p11 = scmp.lt.s32.totalorder %s276_s29, %s276_s29 }
 0x1e6   :  { %p372_p10 = scmp.ne.s32.totalorder %s276_s29, %s371_s30  ;;  %p377_p12 = scmp.lt.s32.totalorder %s371_s30, %s371_s30 }
 0x1e8   :  { %p378_p13 = por %p377_p12, %p376_p11 }
 0x1ea   :  { %p379_p0 = pnand %p378_p13, %p372_p10 }
 0x209   :  { %v180_v40 = vpop.f32.mrf.mxu0 }
 0x20a   :  { %v260_v46 = vmul.f32 %v330_v38, %v180_v40 }
 0x20b   :  { %v310_v42 = vpop.f32.mrf.mxu0  ;;  %v252_v43 = vpop.f32.mrf.mxu1 }
 0x20c   :  { %v261_v44 = vmul.f32 %v257_v41, %v252_v43 }
 0x20d   :  { %v315_v45 = vpop.f32.mrf.mxu1 }
 0x20e   :  { %v264_v47 = vrot.slane %v261_v44, 7 }
 0x210   :  { %v265_v48 = vsel %vm67_vm1, %v264_v47, %v260_v46 }
 0x211   :  { %268 = vst.msk [vmem:[#allocation5] sm:$0x3] %vm267_vm6, %v265_v48 }
 0x212   :  { %382 = shalt.err (!%p379_p0)
}
 0x213   :  { %278 = dma.vmem_to_hbm [thread:$0]  %s276_s29, 32, %s456_s3, [#allocation4]  }
 0x214   :  { %393 = dma.done.wait [#allocation4], 32  }
 0x215   :  { %394 = vsyncadd [#allocation4], 4294967264 }
 0x216   :  { %395 = dma.done.wait [#allocation7], 32  }
 0x217   :  { %396 = vsyncadd [#allocation7], 4294967264 }
 0x218   :  { %295 = vsyncpa [#allocation3], 1 }
 0x219   :  { %296 = vsyncpa [#allocation4], 1 }
 0x21a   :  { %297 = vsyncpa [#allocation7], 1 }

</bundles_post_ra>
